<compile_context>
chip_gen: v5e
topology: v5e:2x2
jax: 0.10.0
libtpu: 0.0.40
codegen_flags: <defaults>
</compile_context>

<pallas_src>
import functools

import jax
import jax.numpy as jnp
from jax import lax
from jax.experimental import pallas as pl
from jax.experimental.pallas import tpu as pltpu


_LANE = 128
_TILE_TARGET_BYTES = 2 << 20   # ~2 MiB per (1, C, TS) activation block
_FUSED_SLAB_BYTES = 2 << 20    # per-batch (C, S) slab small enough to keep VMEM-resident


def _cdiv(a, b):
    return -(-a // b)


def _round_up(a, m):
    return _cdiv(a, m) * m


def _pick_spatial_tile(S, C, itemsize, min_steps=4):
    """Lane-axis spatial tile: multiple of 128, <= ~2 MiB per block, >= min_steps tiles."""
    budget = max(_LANE, (_TILE_TARGET_BYTES // max(C * itemsize, 1)) // _LANE * _LANE)
    cap = max(_LANE, _round_up(_cdiv(S, min_steps), _LANE))
    ts = min(budget, cap)
    if ts >= S:
        return S  # full extent (always a legal block shape)
    return ts


# ----------------------------------------------------------------------------
# Kernel 1 (tiled path): global average pool + FC1 + ReLU + FC2 + sigmoid
#   -> gate (B, C, 1), channels on the sublane axis (no relayout needed later).
# ----------------------------------------------------------------------------
def _pool_excite_kernel(x_ref, w1t_hbm, b1_hbm, w2_hbm, b2_hbm, gate_ref,
                        sum_ref, w1t_v, b1_v, w2_v, b2_v,
                        *, inv_s, spatial, tile, needs_mask):
    s = pl.program_id(1)

    @pl.when(s == 0)
    def _init():
        sum_ref[...] = jnp.zeros_like(sum_ref)

    x = x_ref[...].astype(jnp.float32)                      # (1, C, TS)
    if needs_mask:
        # Partial last spatial tile: zero the out-of-range lanes before reducing.
        lane = lax.broadcasted_iota(jnp.int32, x.shape, 2)
        valid = spatial - s * tile
        x = jnp.where(lane < valid, x, 0.0)
    sum_ref[...] += jnp.sum(x, axis=-1, keepdims=True)      # (1, C, 1)

    @pl.when(s == pl.num_programs(1) - 1)
    def _epilogue():
        # Weights live in HBM (memory_space=ANY); copy them only where they are used,
        # into single-buffered VMEM scratch (no whole-grid double-buffered footprint).
        pltpu.sync_copy(w1t_hbm, w1t_v)
        pltpu.sync_copy(b1_hbm, b1_v)
        pltpu.sync_copy(w2_hbm, w2_v)
        pltpu.sync_copy(b2_hbm, b2_v)

        pooled = sum_ref[0] * inv_s                                            # (C, 1)
        # fc1: h[j] = sum_c W1[j, c] * pooled[c]   (sublane reduction, VPU/XLU)
        h = jnp.sum(w1t_v[...] * pooled, axis=0, keepdims=True) + b1_v[...]    # (1, Ch)
        h = jnp.maximum(h, 0.0)
        # fc2: z[c] = sum_j W2[c, j] * h[j]        (lane reduction, keepdims)
        z = jnp.sum(w2_v[...] * h, axis=1, keepdims=True) + b2_v[...]          # (C, 1)
        gate = 1.0 / (1.0 + jnp.exp(-z))
        gate_ref[...] = gate[None].astype(gate_ref.dtype)                      # (1, C, 1)


def _pool_excite(x, w1t, b1r, w2, b2c):
    """x: (B, C, S) -> gate (B, C, 1) f32."""
    B, C, S = x.shape
    Ch = w1t.shape[1]
    TS = _pick_spatial_tile(S, C, jnp.dtype(x.dtype).itemsize)
    n_s = _cdiv(S, TS)

    kernel = functools.partial(
        _pool_excite_kernel,
        inv_s=1.0 / S, spatial=S, tile=TS, needs_mask=(S % TS) != 0)

    return pl.pallas_call(
        kernel,
        out_shape=jax.ShapeDtypeStruct((B, C, 1), jnp.float32),
        grid_spec=pltpu.PrefetchScalarGridSpec(
            num_scalar_prefetch=0,
            grid=(B, n_s),
            in_specs=[
                pl.BlockSpec((1, C, TS), lambda b, s: (b, 0, s)),
                pl.BlockSpec(memory_space=pl.ANY),   # w1t (C, Ch) in HBM
                pl.BlockSpec(memory_space=pl.ANY),   # b1  (1, Ch) in HBM
                pl.BlockSpec(memory_space=pl.ANY),   # w2  (C, Ch) in HBM
                pl.BlockSpec(memory_space=pl.ANY),   # b2  (C, 1)  in HBM
            ],
            out_specs=pl.BlockSpec((1, C, 1), lambda b, s: (b, 0, 0)),
            scratch_shapes=[
                pltpu.VMEM((1, C, 1), jnp.float32),  # spatial-sum accumulator
                pltpu.VMEM((C, Ch), jnp.float32),    # w1t
                pltpu.VMEM((1, Ch), jnp.float32),    # b1
                pltpu.VMEM((C, Ch), jnp.float32),    # w2
                pltpu.VMEM((C, 1), jnp.float32),     # b2
            ],
        ),
        compiler_params=pltpu.CompilerParams(
            # batch axis parallel -> v7x megacore splits the pooling read across both TCs.
            # TODO(synk): for B == 1 on v7x, additionally split the spatial axis into two
            # parallel halves with a tiny partial-sum combine.
            dimension_semantics=("parallel", "arbitrary"),
        ),
    )(x, w1t, b1r, w2, b2c)


# ----------------------------------------------------------------------------
# Kernel 2 (tiled path): out = x * gate, gate broadcast across the spatial lanes.
# ----------------------------------------------------------------------------
def _scale_kernel(x_ref, g_ref, o_ref):
    o_ref[...] = (x_ref[...].astype(jnp.float32) * g_ref[...]).astype(o_ref.dtype)


def _scale(x, gate):
    """x: (B, C, S), gate: (B, C, 1) f32 -> (B, C, S)."""
    B, C, S = x.shape
    TS = _pick_spatial_tile(S, C, jnp.dtype(x.dtype).itemsize)
    n_s = _cdiv(S, TS)

    return pl.pallas_call(
        _scale_kernel,
        out_shape=jax.ShapeDtypeStruct((B, C, S), x.dtype),
        grid_spec=pltpu.PrefetchScalarGridSpec(
            num_scalar_prefetch=0,
            grid=(B, n_s),
            in_specs=[
                pl.BlockSpec((1, C, TS), lambda b, s: (b, 0, s)),
                pl.BlockSpec((1, C, 1), lambda b, s: (b, 0, 0)),
            ],
            out_specs=pl.BlockSpec((1, C, TS), lambda b, s: (b, 0, s)),
        ),
        compiler_params=pltpu.CompilerParams(
            dimension_semantics=("parallel", "parallel"),
        ),
        # input_output_aliases={0: 0} omitted on purpose: without donated inputs XLA would
        # insert a hidden full copy of x to satisfy the alias.
    )(x, gate)


# ----------------------------------------------------------------------------
# Fused path (small feature maps): pool -> excite -> scale in one kernel,
# x stays resident in VMEM (1 HBM read + 1 write instead of 2 reads + 1 write).
# ----------------------------------------------------------------------------
def _fused_kernel(x_ref, w1t_ref, b1_ref, w2_ref, b2_ref, o_ref, *, inv_s):
    x = x_ref[...].astype(jnp.float32)                        # (1, C, S)
    pooled = jnp.sum(x, axis=-1, keepdims=True)[0] * inv_s    # (C, 1)
    h = jnp.sum(w1t_ref[...] * pooled, axis=0, keepdims=True) + b1_ref[...]   # (1, Ch)
    h = jnp.maximum(h, 0.0)
    z = jnp.sum(w2_ref[...] * h, axis=1, keepdims=True) + b2_ref[...]         # (C, 1)
    gate = 1.0 / (1.0 + jnp.exp(-z))
    o_ref[...] = (x * gate[None]).astype(o_ref.dtype)


def _fused(x, w1t, b1r, w2, b2c):
    B, C, S = x.shape
    Ch = w1t.shape[1]
    return pl.pallas_call(
        functools.partial(_fused_kernel, inv_s=1.0 / S),
        out_shape=jax.ShapeDtypeStruct((B, C, S), x.dtype),
        grid_spec=pltpu.PrefetchScalarGridSpec(
            num_scalar_prefetch=0,
            grid=(B,),
            in_specs=[
                pl.BlockSpec((1, C, S), lambda b: (b, 0, 0)),
                pl.BlockSpec((C, Ch), lambda b: (0, 0)),
                pl.BlockSpec((1, Ch), lambda b: (0, 0)),
                pl.BlockSpec((C, Ch), lambda b: (0, 0)),
                pl.BlockSpec((C, 1), lambda b: (0, 0)),
            ],
            out_specs=pl.BlockSpec((1, C, S), lambda b: (b, 0, 0)),
        ),
        compiler_params=pltpu.CompilerParams(
            dimension_semantics=("parallel",),
        ),
    )(x, w1t, b1r, w2, b2c)


# ----------------------------------------------------------------------------
# SEModule forward: NCHW in / NCHW out, PyTorch nn.Linear weight layout.
#   fc1_w: (C//r, C), fc1_b: (C//r,), fc2_w: (C, C//r), fc2_b: (C,)
# ----------------------------------------------------------------------------
def se_module_forward(x_nchw, fc1_w, fc1_b, fc2_w, fc2_b, *,
                      fused_limit_bytes=_FUSED_SLAB_BYTES):
    B, C, H, W = x_nchw.shape
    S = H * W
    x = x_nchw.reshape(B, C, S)                       # native NCHW layout, free reshape
    Ch = fc1_w.shape[0]

    # Tiny weight prep (a few KiB): fc1 transposed so both FCs are broadcast-and-reduce
    # against channel-on-sublanes operands inside the kernels.
    w1t = jnp.transpose(fc1_w).astype(jnp.float32)    # (C, Ch)
    b1r = fc1_b.reshape(1, Ch).astype(jnp.float32)
    w2 = fc2_w.astype(jnp.float32)                    # (C, Ch)
    b2c = fc2_b.reshape(C, 1).astype(jnp.float32)

    slab_bytes = C * S * jnp.dtype(x.dtype).itemsize  # per-batch (C, S) slab
    if slab_bytes <= fused_limit_bytes:
        out = _fused(x, w1t, b1r, w2, b2c)
    else:
        gate = _pool_excite(x, w1t, b1r, w2, b2c)     # (B, C, 1) f32
        out = _scale(x, gate)
    return out.reshape(B, C, H, W)


if __name__ == "__main__":
    key = jax.random.PRNGKey(0)
    kx, kx2, kw1, kb1, kw2, kb2 = jax.random.split(key, 6)

    # Small shapes consistent with the module (reduction=16 needs channels >= 16).
    B, C = 2, 64
    reduction = 16
    hidden = C // reduction

    # PyTorch-default-style Linear init, weights in PyTorch (out, in) layout.
    lim1 = 1.0 / (C ** 0.5)
    fc1_w = jax.random.uniform(kw1, (hidden, C), jnp.float32, -lim1, lim1)
    fc1_b = jax.random.uniform(kb1, (hidden,), jnp.float32, -lim1, lim1)
    lim2 = 1.0 / (hidden ** 0.5)
    fc2_w = jax.random.uniform(kw2, (C, hidden), jnp.float32, -lim2, lim2)
    fc2_b = jax.random.uniform(kb2, (C,), jnp.float32, -lim2, lim2)

    def reference(xin):
        pooled = jnp.mean(xin, axis=(2, 3))
        h = jnp.maximum(jnp.dot(pooled, fc1_w.T, precision="highest") + fc1_b, 0.0)
        z = jnp.dot(h, fc2_w.T, precision="highest") + fc2_b
        gate = 1.0 / (1.0 + jnp.exp(-z))
        return xin * gate[:, :, None, None]

    # Path 1: fused single-kernel path (small feature map, VMEM resident).
    x1 = jax.random.normal(kx, (B, C, 16, 16), jnp.float32)
    fwd_fused = jax.jit(se_module_forward)
    out1 = jax.block_until_ready(fwd_fused(x1, fc1_w, fc1_b, fc2_w, fc2_b))

    # Path 2: force the tiled two-kernel path, on an awkward spatial size (12*12 = 144,
    # not a multiple of 128) to exercise the masked partial last tile.
    x2 = jax.random.normal(kx2, (B, C, 12, 12), jnp.float32)
    fwd_tiled = jax.jit(functools.partial(se_module_forward, fused_limit_bytes=0))
    out2 = jax.block_until_ready(fwd_tiled(x2, fc1_w, fc1_b, fc2_w, fc2_b))

    ref1, ref2 = reference(x1), reference(x2)
    assert out1.shape == x1.shape and out1.dtype == x1.dtype
    assert out2.shape == x2.shape and out2.dtype == x2.dtype
    assert jnp.allclose(out1, ref1, rtol=1e-3, atol=1e-3)
    assert jnp.allclose(out2, ref2, rtol=1e-3, atol=1e-3)
    print("KERNEL_OK")
</pallas_src>

<mosaic_0001>
module attributes {stable_mosaic.version = 11 : i64} {
  func.func @_fused_kernel(%arg0: i32, %arg1: memref<1x64x256xf32, #tpu.memory_space<vmem>>, %arg2: memref<64x4xf32, #tpu.memory_space<vmem>>, %arg3: memref<1x4xf32, #tpu.memory_space<vmem>>, %arg4: memref<64x4xf32, #tpu.memory_space<vmem>>, %arg5: memref<64x1xf32, #tpu.memory_space<vmem>>, %arg6: memref<1x64x256xf32, #tpu.memory_space<vmem>>) attributes {dimension_semantics = [#tpu.dimension_semantics<parallel>], iteration_bounds = array<i64: 2>, scalar_prefetch = 0 : i64, scratch_operands = 0 : i64, tpu.core_type = #tpu.core_type<tc>, window_params = [{transform_indices = @transform_0, window_bounds = array<i64: 1, 64, 256>}, {pipeline_mode = #tpu.pipeline_mode<synchronous>, transform_indices = @transform_1, window_bounds = array<i64: 64, 4>}, {pipeline_mode = #tpu.pipeline_mode<synchronous>, transform_indices = @transform_2, window_bounds = array<i64: 1, 4>}, {pipeline_mode = #tpu.pipeline_mode<synchronous>, transform_indices = @transform_3, window_bounds = array<i64: 64, 4>}, {pipeline_mode = #tpu.pipeline_mode<synchronous>, transform_indices = @transform_4, window_bounds = array<i64: 64, 1>}, {transform_indices = @transform_5, window_bounds = array<i64: 1, 64, 256>}]} {
    %c0 = arith.constant 0 : index
    %c0_0 = arith.constant 0 : index
    %c0_1 = arith.constant 0 : index
    %0 = vector.load %arg1[%c0, %c0_0, %c0_1] : memref<1x64x256xf32, #tpu.memory_space<vmem>>, vector<1x64x256xf32>
    %cst = arith.constant dense<0.000000e+00> : vector<1x64xf32>
    %1 = vector.multi_reduction <add>, %0, %cst [2] : vector<1x64x256xf32> to vector<1x64xf32>
    %2 = vector.shape_cast %1 : vector<1x64xf32> to vector<1x64x1xf32>
    %3 = vector.shape_cast %2 : vector<1x64x1xf32> to vector<64x1xf32>
    %cst_2 = arith.constant 3.906250e-03 : f32
    %4 = vector.broadcast %cst_2 : f32 to vector<64x1xf32>
    %5 = arith.mulf %3, %4 : vector<64x1xf32>
    %c0_3 = arith.constant 0 : index
    %c0_4 = arith.constant 0 : index
    %6 = vector.load %arg2[%c0_3, %c0_4] : memref<64x4xf32, #tpu.memory_space<vmem>>, vector<64x4xf32>
    %7 = vector.broadcast %5 : vector<64x1xf32> to vector<64x4xf32>
    %8 = arith.mulf %6, %7 : vector<64x4xf32>
    %cst_5 = arith.constant dense<0.000000e+00> : vector<4xf32>
    %9 = vector.multi_reduction <add>, %8, %cst_5 [0] : vector<64x4xf32> to vector<4xf32>
    %10 = vector.shape_cast %9 : vector<4xf32> to vector<1x4xf32>
    %c0_6 = arith.constant 0 : index
    %c0_7 = arith.constant 0 : index
    %11 = vector.load %arg3[%c0_6, %c0_7] : memref<1x4xf32, #tpu.memory_space<vmem>>, vector<1x4xf32>
    %12 = arith.addf %10, %11 : vector<1x4xf32>
    %cst_8 = arith.constant 0.000000e+00 : f32
    %13 = vector.broadcast %cst_8 : f32 to vector<1x4xf32>
    %14 = arith.maximumf %12, %13 : vector<1x4xf32>
    %c0_9 = arith.constant 0 : index
    %c0_10 = arith.constant 0 : index
    %15 = vector.load %arg4[%c0_9, %c0_10] : memref<64x4xf32, #tpu.memory_space<vmem>>, vector<64x4xf32>
    %16 = vector.broadcast %14 : vector<1x4xf32> to vector<64x4xf32>
    %17 = arith.mulf %15, %16 : vector<64x4xf32>
    %cst_11 = arith.constant dense<0.000000e+00> : vector<64xf32>
    %18 = vector.multi_reduction <add>, %17, %cst_11 [1] : vector<64x4xf32> to vector<64xf32>
    %19 = vector.shape_cast %18 : vector<64xf32> to vector<64x1xf32>
    %c0_12 = arith.constant 0 : index
    %c0_13 = arith.constant 0 : index
    %20 = vector.load %arg5[%c0_12, %c0_13] : memref<64x1xf32, #tpu.memory_space<vmem>>, vector<64x1xf32>
    %21 = arith.addf %19, %20 : vector<64x1xf32>
    %cst_14 = arith.constant 0.000000e+00 : f32
    %22 = vector.broadcast %cst_14 : f32 to vector<64x1xf32>
    %23 = arith.subf %22, %21 : vector<64x1xf32>
    %24 = math.exp %23 : vector<64x1xf32>
    %cst_15 = arith.constant 1.000000e+00 : f32
    %25 = vector.broadcast %cst_15 : f32 to vector<64x1xf32>
    %26 = arith.addf %25, %24 : vector<64x1xf32>
    %cst_16 = arith.constant 1.000000e+00 : f32
    %27 = vector.broadcast %cst_16 : f32 to vector<64x1xf32>
    %28 = arith.divf %27, %26 : vector<64x1xf32>
    %29 = vector.shape_cast %28 : vector<64x1xf32> to vector<1x64x1xf32>
    %30 = vector.broadcast %29 : vector<1x64x1xf32> to vector<1x64x256xf32>
    %31 = arith.mulf %0, %30 : vector<1x64x256xf32>
    %c0_17 = arith.constant 0 : index
    %c0_18 = arith.constant 0 : index
    %c0_19 = arith.constant 0 : index
    %32 = vector.load %arg6[%c0_17, %c0_18, %c0_19] : memref<1x64x256xf32, #tpu.memory_space<vmem>>, vector<1x64x256xf32>
    tpu.vector_store %arg6[%c0_17, %c0_18, %c0_19], %31 {strides = array<i32>} : memref<1x64x256xf32, #tpu.memory_space<vmem>>, vector<1x64x256xf32>,
    return
  }
  func.func @transform_0(%arg0: i32) -> (i32, i32, i32) {
    %c0_i32 = arith.constant 0 : i32
    %c0_i32_0 = arith.constant 0 : i32
    %c0_i32_1 = arith.constant 0 : i32
    return %arg0, %c0_i32, %c0_i32_0 : i32, i32, i32
  }
  func.func @transform_1(%arg0: i32) -> (i32, i32) {
    %c0_i32 = arith.constant 0 : i32
    %c0_i32_0 = arith.constant 0 : i32
    %c0_i32_1 = arith.constant 0 : i32
    return %c0_i32, %c0_i32_0 : i32, i32
  }
  func.func @transform_2(%arg0: i32) -> (i32, i32) {
    %c0_i32 = arith.constant 0 : i32
    %c0_i32_0 = arith.constant 0 : i32
    %c0_i32_1 = arith.constant 0 : i32
    return %c0_i32, %c0_i32_0 : i32, i32
  }
  func.func @transform_3(%arg0: i32) -> (i32, i32) {
    %c0_i32 = arith.constant 0 : i32
    %c0_i32_0 = arith.constant 0 : i32
    %c0_i32_1 = arith.constant 0 : i32
    return %c0_i32, %c0_i32_0 : i32, i32
  }
  func.func @transform_4(%arg0: i32) -> (i32, i32) {
    %c0_i32 = arith.constant 0 : i32
    %c0_i32_0 = arith.constant 0 : i32
    %c0_i32_1 = arith.constant 0 : i32
    return %c0_i32, %c0_i32_0 : i32, i32
  }
  func.func @transform_5(%arg0: i32) -> (i32, i32, i32) {
    %c0_i32 = arith.constant 0 : i32
    %c0_i32_0 = arith.constant 0 : i32
    %c0_i32_1 = arith.constant 0 : i32
    return %arg0, %c0_i32, %c0_i32_0 : i32, i32, i32
  }
}

</mosaic_0001>

<bundles_post_ra>
// kernel: se_module_forward.1
= control target key start
LH: loop header
LB: loop body
LE: loop exit
PB: predicated region body
PF: predicated region fallthrough
CT: control target
= control target key end

     0   :  { %s746_s18 = smov 0   ;;  %s1017_s0 = inlined_call_operand.vmem [shape: f32[2,64,256], index: 0, kind: input, shape index: {}]   ;;  %s1018_s1 = inlined_call_operand.vmem [shape: f32[64,4], index: 1, kind: input, shape index: {}]   ;;  %s1019_s2 = inlined_call_operand.vmem [shape: f32[1,4], index: 2, kind: input, shape index: {}]   ;;  %s1020_s3 = inlined_call_operand.vmem [shape: f32[64,4], index: 3, kind: input, shape index: {}]   ;;  %s1021_s4 = inlined_call_operand.vmem [shape: f32[64,1], index: 4, kind: input, shape index: {}]   ;;  %s1022_s5 = inlined_call_operand.vmem [shape: f32[2,64,256], index: 5, kind: output, shape index: {}]  }
   0x1 LB: > { %s650_s19 = sadd.s32 4294967295, %s713_s18   ;;  %p654_p0 = scmp.ge.s32.totalorder %s713_s18, 1  ;;  %s713_s18 = sphi %s746_s18, %s15_s18  }
   0x2   : > { %p187_p1 = scmp.lt.s32.totalorder %s713_s18, 3 }
   0x4   : > { %p188_p2 = pnand %p654_p0, %p187_p1 }
   0x5   : > { %p215_p3 = scmp.lt.s32.totalorder (!%p188_p2), %s650_s19, 1 }
   0x6   : > { %191 = sbr.rel (%p188_p2) target bundleno = 468 (0x1d4), region = 40 }
   0xb   : > { %s1026_s19 = smov (!%p215_p3, %s650_s19), 1  ;;  %v273_v28 = vld [vmem:[%s1018_s1] sm:$0xff]  ;;  %v275_v30 = vld [vmem:[%s1018_s1 + $0x10] sm:$0xff]  ;;  %v274_v31 = vld [vmem:[%s1018_s1 + $0x8] sm:$0xff]  ;;  %vm289_vm0 = vcmask 31744  }
   0xc   : > { %s661_s20 = sshll.u32 %s1026_s19, 7  ;;  %v276_v35 = vld [vmem:[%s1018_s1 + $0x18] sm:$0xff]  ;;  %v277_v43 = vld [vmem:[%s1018_s1 + $0x20] sm:$0xff]  ;;  %v278_v45 = vld [vmem:[%s1018_s1 + $0x28] sm:$0xff] }
   0xd   : > { %s219_s23 = scalar_lea.vmem %s1017_s0, %s661_s20  ;;  %v279_v54 = vld [vmem:[%s1018_s1 + $0x30] sm:$0xff]  ;;  %v280_v57 = vld [vmem:[%s1018_s1 + $0x38] sm:$0xff]  ;;  %s980_s7 = scalar_lea.vmem %s1022_s5, %s661_s20 }
   0xe   : > { %v762_v0 = vld [vmem:[%s219_s23] sm:$0xff]  ;;  %v764_v1 = vld [vmem:[%s219_s23 + $0x8] sm:$0xff]  ;;  %v780_v9 = vld [vmem:[%s219_s23 + $0x10] sm:$0xff] }
   0xf   : > { %v766_v2 = vld [vmem:[%s219_s23 + $0x20] sm:$0xff]  ;;  %v241_v3 = vadd.f32 %v764_v1, %v762_v0  ;;  %v770_v4 = vld [vmem:[%s219_s23 + $0x28] sm:$0xff]  ;;  %v782_v10 = vld [vmem:[%s219_s23 + $0x18] sm:$0xff] }
  0x10   : > { %v772_v5 = vld [vmem:[%s219_s23 + $0x40] sm:$0xff]  ;;  %v774_v6 = vld [vmem:[%s219_s23 + $0x48] sm:$0xff]  ;;  %v247_v7 = vadd.f32 %v770_v4, %v766_v2  ;;  %v784_v11 = vld [vmem:[%s219_s23 + $0x30] sm:$0xff]  ;;  %v244_v15 = vadd.f32 %v782_v10, %v780_v9 }
  0x11   : > { %v253_v8 = vadd.f32 %v774_v6, %v772_v5  ;;  %242 = vadd.xlane.f32.xlu0 %v241_v3  ;;  %v786_v12 = vld [vmem:[%s219_s23 + $0x38] sm:$0xff]  ;;  %v788_v13 = vld [vmem:[%s219_s23 + $0x50] sm:$0xff]  ;;  %v798_v18 = vld [vmem:[%s219_s23 + $0x60] sm:$0xff] }
  0x12   : > { %248 = vadd.xlane.f32.xlu1 %v247_v7  ;;  %v790_v14 = vld [vmem:[%s219_s23 + $0x58] sm:$0xff]  ;;  %v250_v16 = vadd.f32 %v786_v12, %v784_v11  ;;  %v800_v19 = vld [vmem:[%s219_s23 + $0x68] sm:$0xff]  ;;  %v802_v20 = vld [vmem:[%s219_s23 + $0x70] sm:$0xff] }
  0x13   : > { %254 = vadd.xlane.f32.xlu2 %v253_v8  ;;  %v256_v17 = vadd.f32 %v790_v14, %v788_v13  ;;  %v804_v21 = vld [vmem:[%s219_s23 + $0x78] sm:$0xff]  ;;  %v259_v22 = vadd.f32 %v800_v19, %v798_v18 }
  0x14   : > { %v262_v23 = vadd.f32 %v804_v21, %v802_v20 }
  0x19   : > { %245 = vadd.xlane.f32.xlu0 %v244_v15 }
  0x1a   : > { %251 = vadd.xlane.f32.xlu1 %v250_v16 }
  0x1b   : > { %257 = vadd.xlane.f32.xlu2 %v256_v17 }
  0x21   : > { %260 = vadd.xlane.f32.xlu0 %v259_v22 }
  0x22   : > { %263 = vadd.xlane.f32.xlu1 %v262_v23 }
  0x84   : > { %v243_v24 = vpop.xlane.xlu0 %242 }
  0x85   : > { %v249_v25 = vpop.xlane.xlu1 %248  ;;  %v265_v27 = vmul.f32 0.00390625, %v243_v24 }
  0x86   : > { %v255_v26 = vpop.xlane.xlu2 %254  ;;  %v267_v29 = vmul.f32 0.00390625, %v249_v25 }
  0x87   : > { %v281_v33 = vmul.f32 %v273_v28, %v265_v27  ;;  %v269_v40 = vmul.f32 0.00390625, %v255_v26  ;;  %v311_v28 = vld [vmem:[%s1019_s2] sm:$0x1] }
  0x88   : > { %v283_v39 = vmul.f32 %v275_v30, %v267_v29 }
  0x89   : > { %v290_v46 = vsel %vm289_vm0, %v281_v33, 0.0  ;;  %v285_v50 = vmul.f32 %v277_v43, %v269_v40  ;;  %v315_v33 = vld [vmem:[%s1020_s3 + $0x8] sm:$0xff]  ;;  %v318_v43 = vld [vmem:[%s1020_s3 + $0x20] sm:$0xff] }
  0x8a   : > { %v293_v49 = vsel %vm289_vm0, %v283_v39, 0.0 }
  0x8b   : > { %v297_v61 = vsel %vm289_vm0, %v285_v50, 0.0 }
  0x8c   : > { %v246_v32 = vpop.xlane.xlu0 %245 }
  0x8d   : > { %v266_v34 = vmul.f32 0.00390625, %v246_v32  ;;  %v252_v36 = vpop.xlane.xlu1 %251  ;;  %v316_v32 = vld [vmem:[%s1020_s3 + $0x10] sm:$0xff] }
  0x8e   : > { %v258_v37 = vpop.xlane.xlu2 %257  ;;  %v268_v38 = vmul.f32 0.00390625, %v252_v36 }
  0x8f   : > { %v282_v41 = vmul.f32 %v274_v31, %v266_v34  ;;  %v270_v42 = vmul.f32 0.00390625, %v258_v37  ;;  %v314_v34 = vld [vmem:[%s1020_s3] sm:$0xff] }
  0x90   : > { %v284_v44 = vmul.f32 %v276_v35, %v268_v38 }
  0x91   : > { %v291_v47 = vsel %vm289_vm0, %v282_v41, 0.0  ;;  %v286_v52 = vmul.f32 %v278_v45, %v270_v42  ;;  %v319_v42 = vld [vmem:[%s1020_s3 + $0x28] sm:$0xff] }
  0x92   : > { %v292_v48 = vadd.f32 %v291_v47, %v290_v46  ;;  %v295_v51 = vsel %vm289_vm0, %v284_v44, 0.0  ;;  %v317_v44 = vld [vmem:[%s1020_s3 + $0x18] sm:$0xff] }
  0x93   : > { %v299_v62 = vsel %vm289_vm0, %v286_v52, 0.0  ;;  %v320_v52 = vld [vmem:[%s1020_s3 + $0x30] sm:$0xff] }
  0x94   : > { %v294_v53 = vadd.f32 %v293_v49, %v292_v48  ;;  %v261_v55 = vpop.xlane.xlu0 %260 }
  0x95   : > { %v271_v56 = vmul.f32 0.00390625, %v261_v55  ;;  %v264_v58 = vpop.xlane.xlu1 %263 }
  0x96   : > { %v296_v59 = vadd.f32 %v295_v51, %v294_v53  ;;  %v272_v60 = vmul.f32 0.00390625, %v264_v58  ;;  %v321_v51 = vld [vmem:[%s1020_s3 + $0x38] sm:$0xff]  ;;  %v356_v58 = vld [vmem:[%s1021_s4 + $0x8] sm:$0xff] }
  0x97   : > { %v287_v63 = vmul.f32 %v279_v54, %v271_v56 }
  0x98   : > { %v298_v3 = vadd.f32 %v297_v61, %v296_v59  ;;  %v288_v7 = vmul.f32 %v280_v57, %v272_v60  ;;  %v357_v57 = vld [vmem:[%s1021_s4 + $0x10] sm:$0xff]  ;;  %v355_v59 = vld [vmem:[%s1021_s4] sm:$0xff] }
  0x99   : > { %v301_v8 = vsel %vm289_vm0, %v287_v63, 0.0 }
  0x9a   : > { %v300_v15 = vadd.f32 %v299_v62, %v298_v3  ;;  %v303_v16 = vsel %vm289_vm0, %v288_v7, 0.0 }
  0x9c   : > { %v302_v17 = vadd.f32 %v301_v8, %v300_v15 }
  0x9e   : > { %v304_v22 = vadd.f32 %v303_v16, %v302_v17  ;;  %v715_v16 = vmov 0  }
  0x9f   : > { %674 = vset.pattern.permute.xlu0 %v715_v16  ;;  %673 = vset.pattern.permute.xlu2 %v715_v16 }
  0xa0   : > { %v305_v23 = vrot.slane %v304_v22, 4  ;;  %672 = vset.pattern.permute.xlu1 %v715_v16 }
  0xa2   : > { %v306_v24 = vadd.f32 %v305_v23, %v304_v22 }
  0xa4   : > { %v307_v25 = vrot.slane %v306_v24, 2 }
  0xa6   : > { %v308_v26 = vadd.f32 %v307_v25, %v306_v24  ;;  %v360_v25 = vld [vmem:[%s1021_s4 + $0x28] sm:$0xff] }
  0xa8   : > { %v309_v27 = vrot.slane %v308_v26, 1 }
  0xaa   : > { %v310_v29 = vadd.f32 %v309_v27, %v308_v26  ;;  %v359_v26 = vld [vmem:[%s1021_s4 + $0x20] sm:$0xff]  ;;  %v358_v27 = vld [vmem:[%s1021_s4 + $0x18] sm:$0xff] }
  0xac   : > { %v312_v30 = vadd.f32 %v311_v28, %v310_v29 }
  0xae   : > { %v313_v31 = vmax.f32 %v312_v30, 0.0 }
  0xb0   : > { %v322_v35 = vperm.slane %v313_v31, 0 }
  0xb2   : > { %v325_v36 = vmul.f32 %v322_v35, %v316_v32  ;;  %v324_v37 = vmul.f32 %v322_v35, %v315_v33  ;;  %v323_v38 = vmul.f32 %v322_v35, %v314_v34  ;;  %v328_v45 = vmul.f32 %v322_v35, %v319_v42 }
  0xb3   : > { %v327_v46 = vmul.f32 %v322_v35, %v318_v43  ;;  %v326_v47 = vmul.f32 %v322_v35, %v317_v44  ;;  %v330_v53 = vmul.f32 %v322_v35, %v321_v51  ;;  %v329_v54 = vmul.f32 %v322_v35, %v320_v52 }
  0xb4   : > { %v337_v39 = vsel %vm289_vm0, %v325_v36, 0.0  ;;  %v334_v40 = vsel %vm289_vm0, %v324_v37, 0.0  ;;  %v331_v41 = vsel %vm289_vm0, %v323_v38, 0.0  ;;  %v346_v48 = vsel %vm289_vm0, %v328_v45, 0.0  ;;  %v361_v45 = vld [vmem:[%s1021_s4 + $0x30] sm:$0xff] }
  0xb5   : > { %338 = vadd.xlane.f32.xlu1 %v337_v39  ;;  %335 = vadd.xlane.f32.xlu0 %v334_v40  ;;  %v343_v49 = vsel %vm289_vm0, %v327_v46, 0.0  ;;  %v340_v50 = vsel %vm289_vm0, %v326_v47, 0.0  ;;  %v352_v55 = vsel %vm289_vm0, %v330_v53, 0.0  ;;  %v349_v56 = vsel %vm289_vm0, %v329_v54, 0.0 }
  0xb6   : > { %332 = vadd.xlane.f32.xlu2 %v331_v41  ;;  %v362_v41 = vld [vmem:[%s1021_s4 + $0x38] sm:$0xff] }
  0xbd   : > { %347 = vadd.xlane.f32.xlu1 %v346_v48  ;;  %344 = vadd.xlane.f32.xlu0 %v343_v49 }
  0xbe   : > { %341 = vadd.xlane.f32.xlu2 %v340_v50 }
  0xc5   : > { %353 = vadd.xlane.f32.xlu0 %v352_v55 }
  0xc6   : > { %350 = vadd.xlane.f32.xlu2 %v349_v56 }
 0x128   : > { %v339_v60 = vpop.xlane.xlu1 %338  ;;  %v336_v61 = vpop.xlane.xlu0 %335 }
 0x129   : > { %v365_v62 = vadd.f32 %v357_v57, %v339_v60  ;;  %v364_v63 = vadd.f32 %v356_v58, %v336_v61  ;;  %v333_v3 = vpop.xlane.xlu2 %332 }
 0x12a   : > { %v363_v7 = vadd.f32 %v355_v59, %v333_v3 }
 0x12b   : > { %v373_v8 = vsub.f32 0.0, %v365_v62  ;;  %v372_v15 = vsub.f32 0.0, %v364_v63 }
 0x12c   : > { %v371_v17 = vsub.f32 0.0, %v363_v7 }
 0x12d   : > { %v383_v22 = vmul.f32 1.442695, %v373_v8  ;;  %v381_v23 = vmul.f32 1.442695, %v372_v15 }
 0x12e   : > { %v379_v24 = vmul.f32 1.442695, %v371_v17 }
 0x12f   : > { %675 = vpow2.f32 %v383_v22 }
 0x130   : > { %677 = vpow2.f32 %v381_v23  ;;  %v348_v28 = vpop.xlane.xlu1 %347  ;;  %v345_v29 = vpop.xlane.xlu0 %344 }
 0x131   : > { %679 = vpow2.f32 %v379_v24  ;;  %v368_v30 = vadd.f32 %v360_v25, %v348_v28  ;;  %v367_v31 = vadd.f32 %v359_v26, %v345_v29  ;;  %v342_v32 = vpop.xlane.xlu2 %341 }
 0x132   : > { %v366_v33 = vadd.f32 %v358_v27, %v342_v32 }
 0x133   : > { %v376_v34 = vsub.f32 0.0, %v368_v30  ;;  %v375_v35 = vsub.f32 0.0, %v367_v31 }
 0x134   : > { %v374_v36 = vsub.f32 0.0, %v366_v33 }
 0x135   : > { %v676_v37 = vpop.eup %675  ;;  %v389_v38 = vmul.f32 1.442695, %v376_v34  ;;  %v387_v44 = vmul.f32 1.442695, %v375_v35 }
 0x136   : > { %v678_v39 = vpop.eup %677  ;;  %v397_v40 = vadd.f32 1.0, %v676_v37  ;;  %v385_v47 = vmul.f32 1.442695, %v374_v36 }
 0x137   : > { %v680_v42 = vpop.eup %679  ;;  %v898_v43 = vadd.f32 1.0, %v678_v39  ;;  %681 = vpow2.f32 %v389_v38 }
 0x138   : > { %683 = vrcp.f32 %v397_v40  ;;  %v903_v46 = vadd.f32 1.0, %v680_v42  ;;  %v354_v48 = vpop.xlane.xlu0 %353  ;;  %v442_v54 = vand.u32 2147483647, %v397_v40  ;;  %vm438_vm1 = vweird.f32 %v397_v40 }
 0x139   : > { %685 = vrcp.f32 %v898_v43  ;;  %v370_v49 = vadd.f32 %v362_v41, %v354_v48  ;;  %v351_v50 = vpop.xlane.xlu2 %350  ;;  %v444_v62 = vand.u32 2147483648, %v397_v40  ;;  %vm423_vm3 = vweird.f32 %v898_v43 }
 0x13a   : > { %687 = vrcp.f32 %v903_v46  ;;  %v369_v51 = vadd.f32 %v361_v45, %v351_v50  ;;  %vm910_vm2 = vcmp.eq.f32.partialorder %v442_v54, 8.507059e+37  ;;  %v427_v16 = vand.u32 2147483647, %v898_v43 }
 0x13b   : > { %689 = vpow2.f32 %v387_v44  ;;  %v378_v52 = vsub.f32 0.0, %v370_v49  ;;  %v429_v25 = vand.u32 2147483648, %v898_v43  ;;  %v412_v26 = vand.u32 2147483647, %v903_v46 }
 0x13c   : > { %691 = vpow2.f32 %v385_v47  ;;  %v377_v53 = vsub.f32 0.0, %v369_v51  ;;  %v414_v31 = vand.u32 2147483648, %v903_v46  ;;  %v445_v37 = vor.u32 1.1754944e-38, %v444_v62 }
 0x13d   : > { %v682_v55 = vpop.eup %681  ;;  %v393_v56 = vmul.f32 1.442695, %v378_v52  ;;  %vm428_vm8 = vcmp.eq.f32.partialorder %v427_v16, 8.507059e+37  ;;  %v430_v42 = vor.u32 1.1754944e-38, %v429_v25  ;;  %vm408_vm10 = vweird.f32 %v903_v46 }
 0x13e   : > { %v684_v57 = vpop.eup %683  ;;  %v907_v58 = vadd.f32 1.0, %v682_v55  ;;  %v391_v59 = vmul.f32 1.442695, %v377_v53  ;;  %v415_v48 = vor.u32 1.1754944e-38, %v414_v31  ;;  %vm413_vm12 = vcmp.eq.f32.partialorder %v412_v26, 8.507059e+37 }
 0x13f   : > { %v686_v60 = vpop.eup %685  ;;  %693 = vpow2.f32 %v393_v56  ;;  %v434_v61 = vmul.f32 %v684_v57, %v397_v40  ;;  %vm439_vm4 = vweird.f32 %v684_v57 }
 0x140   : > { %v688_v63 = vpop.eup %687  ;;  %695 = vrcp.f32 %v907_v58  ;;  %v419_v7 = vmul.f32 %v686_v60, %v898_v43  ;;  %vm424_vm5 = vweird.f32 %v686_v60  ;;  %vm440_vm7 = vmor %vm438_vm1, %vm439_vm4 }
 0x141   : > { %v690_v8 = vpop.eup %689  ;;  %697 = vpow2.f32 %v391_v59  ;;  %v435_v15 = vsub.f32 1.0, %v434_v61  ;;  %v404_v17 = vmul.f32 %v688_v63, %v903_v46  ;;  %vm409_vm6 = vweird.f32 %v688_v63  ;;  %vm425_vm9 = vmor %vm423_vm3, %vm424_vm5 }
 0x142   : > { %v692_v22 = vpop.eup %691  ;;  %v918_v23 = vadd.f32 1.0, %v690_v8  ;;  %v420_v24 = vsub.f32 1.0, %v419_v7  ;;  %vm410_vm11 = vmor %vm408_vm10, %vm409_vm6 }
 0x143   : > { %v922_v27 = vadd.f32 1.0, %v692_v22  ;;  %v436_v28 = vmul.f32 %v684_v57, %v435_v15  ;;  %v405_v29 = vsub.f32 1.0, %v404_v17 }
 0x144   : > { %699 = vrcp.f32 %v918_v23  ;;  %v421_v30 = vmul.f32 %v686_v60, %v420_v24  ;;  %v474_v56 = vand.u32 2147483648, %v918_v23  ;;  %v472_v62 = vand.u32 2147483647, %v918_v23 }
 0x145   : > { %v694_v32 = vpop.eup %693  ;;  %701 = vrcp.f32 %v922_v27  ;;  %v437_v33 = vadd.f32 %v684_v57, %v436_v28  ;;  %v406_v34 = vmul.f32 %v688_v63, %v405_v29  ;;  %v457_v8 = vand.u32 2147483647, %v922_v27 }
 0x146   : > { %v927_v35 = vpop.eup %695  ;;  %v929_v36 = vadd.f32 1.0, %v694_v32  ;;  %v422_v38 = vadd.f32 %v686_v60, %v421_v30  ;;  %vm468_vm15 = vweird.f32 %v918_v23  ;;  %vm453_vm0 = vweird.f32 %v922_v27 }
 0x147   : > { %v698_v39 = vpop.eup %697  ;;  %v441_v41 = vsel %vm440_vm7, %v684_v57, %v437_v33  ;;  %v407_v44 = vadd.f32 %v688_v63, %v406_v34  ;;  %v479_v51 = vmul.f32 %v927_v35, %v907_v58  ;;  %v475_v17 = vor.u32 1.1754944e-38, %v474_v56 }
 0x148   : > { %v936_v45 = vadd.f32 1.0, %v698_v39  ;;  %v446_v47 = vsel %vm910_vm2, %v445_v37, %v441_v41  ;;  %v426_v40 = vsel %vm425_vm9, %v686_v60, %v422_v38  ;;  %703 = vrcp.f32 %v929_v36 }
 0x149   : > { %535 = vperm.xlu0 %674, %v446_v47   ;;  %v431_v49 = vsel %vm428_vm8, %v430_v42, %v426_v40  ;;  %v411_v50 = vsel %vm410_vm11, %v688_v63, %v407_v44  ;;  %v480_v59 = vsub.f32 1.0, %v479_v51  ;;  %v459_v63 = vand.u32 2147483648, %v922_v27 }
 0x14a   : > { %v700_v43 = vpop.eup %699  ;;  %705 = vrcp.f32 %v936_v45  ;;  %530 = vperm.xlu2 %673, %v431_v49   ;;  %v416_v46 = vsel %vm413_vm12, %v415_v48, %v411_v50  ;;  %vm473_vm2 = vcmp.eq.f32.partialorder %v472_v62, 8.507059e+37  ;;  %vm458_vm4 = vcmp.eq.f32.partialorder %v457_v8, 8.507059e+37 }
 0x14b   : > { %v702_v52 = vpop.eup %701  ;;  %525 = vperm.xlu1 %672, %v416_v46   ;;  %v464_v53 = vmul.f32 %v700_v43, %v918_v23  ;;  %vm469_vm13 = vweird.f32 %v700_v43  ;;  %v481_v24 = vmul.f32 %v927_v35, %v480_v59  ;;  %v460_v28 = vor.u32 1.1754944e-38, %v459_v63 }
 0x14c   : > { %v449_v54 = vmul.f32 %v702_v52, %v922_v27  ;;  %vm454_vm14 = vweird.f32 %v702_v52  ;;  %vm470_vm1 = vmor %vm468_vm15, %vm469_vm13  ;;  %v504_v23 = vand.u32 2147483648, %v936_v45  ;;  %v502_v33 = vand.u32 2147483647, %v936_v45 }
 0x14d   : > { %v465_v55 = vsub.f32 1.0, %v464_v53  ;;  %vm455_vm3 = vmor %vm453_vm0, %vm454_vm14  ;;  %v482_v34 = vadd.f32 %v927_v35, %v481_v24  ;;  %vm484_vm6 = vweird.f32 %v927_v35  ;;  %v489_v38 = vand.u32 2147483648, %v907_v58 }
 0x14e   : > { %v450_v57 = vsub.f32 1.0, %v449_v54  ;;  %v948_v60 = vpop.eup %703  ;;  %vm498_vm7 = vweird.f32 %v936_v45  ;;  %vm483_vm8 = vweird.f32 %v907_v58  ;;  %v487_v41 = vand.u32 2147483647, %v907_v58 }
 0x14f   : > { %v466_v61 = vmul.f32 %v700_v43, %v465_v55  ;;  %v509_v25 = vmul.f32 %v948_v60, %v929_v36  ;;  %v505_v42 = vor.u32 1.1754944e-38, %v504_v23  ;;  %vm485_vm10 = vmor %vm483_vm8, %vm484_vm6  ;;  %vm503_vm11 = vcmp.eq.f32.partialorder %v502_v33, 8.507059e+37 }
 0x150   : > { %v706_v3 = vpop.eup %705  ;;  %v451_v7 = vmul.f32 %v702_v52, %v450_v57  ;;  %v486_v47 = vsel %vm485_vm10, %v927_v35, %v482_v34  ;;  %v490_v49 = vor.u32 1.1754944e-38, %v489_v38  ;;  %vm488_vm12 = vcmp.eq.f32.partialorder %v487_v41, 8.507059e+37 }
 0x151   : > { %v467_v15 = vadd.f32 %v700_v43, %v466_v61  ;;  %v494_v16 = vmul.f32 %v706_v3, %v936_v45  ;;  %vm499_vm5 = vweird.f32 %v706_v3  ;;  %v510_v37 = vsub.f32 1.0, %v509_v25 }
 0x152   : > { %v452_v22 = vadd.f32 %v702_v52, %v451_v7  ;;  %vm500_vm9 = vmor %vm498_vm7, %vm499_vm5  ;;  %v491_v50 = vsel %vm488_vm12, %v490_v49, %v486_v47  ;;  %vm514_vm13 = vweird.f32 %v948_v60  ;;  %v519_v58 = vand.u32 2147483648, %v929_v36 }
 0x153   : > { %v471_v26 = vsel %vm470_vm1, %v700_v43, %v467_v15  ;;  %v495_v29 = vsub.f32 1.0, %v494_v16  ;;  %v511_v48 = vmul.f32 %v948_v60, %v510_v37  ;;  %vm513_vm14 = vweird.f32 %v929_v36 }
 0x154   : > { %v476_v30 = vsel %vm473_vm2, %v475_v17, %v471_v26  ;;  %v456_v31 = vsel %vm455_vm3, %v702_v52, %v452_v22  ;;  %v517_v43 = vand.u32 2147483647, %v929_v36  ;;  %vm515_vm15 = vmor %vm513_vm14, %vm514_vm13  ;;  %v520_v46 = vor.u32 1.1754944e-38, %v519_v58 }
 0x155   : > { %545 = vperm.xlu1 %672, %v476_v30   ;;  %v461_v27 = vsel %vm458_vm4, %v460_v28, %v456_v31  ;;  %v496_v32 = vmul.f32 %v706_v3, %v495_v29  ;;  %v512_v45 = vadd.f32 %v948_v60, %v511_v48 }
 0x156   : > { %540 = vperm.xlu2 %673, %v461_v27   ;;  %vm518_vm0 = vcmp.eq.f32.partialorder %v517_v43, 8.507059e+37 }
 0x157   : > { %v497_v39 = vadd.f32 %v706_v3, %v496_v32  ;;  %v516_v35 = vsel %vm515_vm15, %v948_v60, %v512_v45 }
 0x158   : > { %v521_v51 = vsel %vm518_vm0, %v520_v46, %v516_v35 }
 0x159   : > { %v501_v44 = vsel %vm500_vm9, %v706_v3, %v497_v39 }
 0x15a   : > { %v506_v40 = vsel %vm503_vm11, %v505_v42, %v501_v44 }
 0x15d   : > { %555 = vperm.xlu1 %672, %v506_v40  }
 0x15e   : > { %550 = vperm.xlu2 %673, %v491_v50  }
 0x166   : > { %560 = vperm.xlu2 %673, %v521_v51  }
 0x1a4   : > { %v531_v36 = vpop.permute.xlu2 %530 }
 0x1a5   : > { %v565_v52 = vmul.f32 %v531_v36, %v780_v9  ;;  %v566_v53 = vmul.f32 %v531_v36, %v782_v10 }
 0x1a7   : > { %581 = vst [vmem:[%s980_s7 + $0x10] sm:$0xff] %v565_v52 }
 0x1a8   : > { %582 = vst [vmem:[%s980_s7 + $0x18] sm:$0xff] %v566_v53 }
 0x1b0   : > { %v541_v54 = vpop.permute.xlu2 %540 }
 0x1b1   : > { %v569_v55 = vmul.f32 %v541_v54, %v784_v11  ;;  %v570_v56 = vmul.f32 %v541_v54, %v786_v12 }
 0x1b3   : > { %585 = vst [vmem:[%s980_s7 + $0x30] sm:$0xff] %v569_v55 }
 0x1b4   : > { %586 = vst [vmem:[%s980_s7 + $0x38] sm:$0xff] %v570_v56 }
 0x1b8   : > { %v551_v57 = vpop.permute.xlu2 %550 }
 0x1b9   : > { %v573_v59 = vmul.f32 %v551_v57, %v788_v13  ;;  %v574_v9 = vmul.f32 %v551_v57, %v790_v14 }
 0x1bb   : > { %589 = vst [vmem:[%s980_s7 + $0x50] sm:$0xff] %v573_v59  ;;  %v536_v10 = vpop.permute.xlu0 %535 }
 0x1bc   : > { %590 = vst [vmem:[%s980_s7 + $0x58] sm:$0xff] %v574_v9  ;;  %v567_v60 = vmul.f32 %v536_v10, %v766_v2  ;;  %v568_v11 = vmul.f32 %v536_v10, %v770_v4 }
 0x1bd   : > { %v526_v12 = vpop.permute.xlu1 %525 }
 0x1be   : > { %583 = vst [vmem:[%s980_s7 + $0x20] sm:$0xff] %v567_v60  ;;  %v563_v61 = vmul.f32 %v526_v12, %v762_v0  ;;  %v564_v62 = vmul.f32 %v526_v12, %v764_v1 }
 0x1bf   : > { %584 = vst [vmem:[%s980_s7 + $0x28] sm:$0xff] %v568_v11 }
 0x1c0   : > { %579 = vst [vmem:[%s980_s7] sm:$0xff] %v563_v61  ;;  %v561_v13 = vpop.permute.xlu2 %560 }
 0x1c1   : > { %580 = vst [vmem:[%s980_s7 + $0x8] sm:$0xff] %v564_v62  ;;  %v577_v14 = vmul.f32 %v561_v13, %v802_v20  ;;  %v578_v2 = vmul.f32 %v561_v13, %v804_v21 }
 0x1c3   : > { %593 = vst [vmem:[%s980_s7 + $0x70] sm:$0xff] %v577_v14 }
 0x1c4   : > { %594 = vst [vmem:[%s980_s7 + $0x78] sm:$0xff] %v578_v2 }
 0x1c7   : > { %v546_v4 = vpop.permute.xlu1 %545 }
 0x1c8   : > { %v571_v63 = vmul.f32 %v546_v4, %v772_v5  ;;  %v572_v3 = vmul.f32 %v546_v4, %v774_v6 }
 0x1ca   : > { %587 = vst [vmem:[%s980_s7 + $0x40] sm:$0xff] %v571_v63 }
 0x1cb   : > { %588 = vst [vmem:[%s980_s7 + $0x48] sm:$0xff] %v572_v3 }
 0x1cf   : > { %v556_v0 = vpop.permute.xlu1 %555 }
 0x1d0   : > { %v575_v1 = vmul.f32 %v556_v0, %v798_v18  ;;  %v576_v7 = vmul.f32 %v556_v0, %v800_v19 }
 0x1d2   : > { %591 = vst [vmem:[%s980_s7 + $0x60] sm:$0xff] %v575_v1 }
 0x1d3   : > { %592 = vst [vmem:[%s980_s7 + $0x68] sm:$0xff] %v576_v7 }
 0x1d4 PF: > { %s15_s18 = sadd.s32 1, %s713_s18  }
 0x1d5   : > { %p12_p4 = scmp.ge.s32.totalorder %s15_s18, 4  }
 0x1d7   :  { %14 = sbr.rel (!%p12_p4) target bundleno = 1 (0x1), region = 70 }

</bundles_post_ra>
